<compile_context>
chip_gen: v6e
topology: v6e:2x2x1
jax: 0.10.0
libtpu: 0.0.40
codegen_flags: <defaults>
</compile_context>

<pallas_src>
import jax
import jax.numpy as jnp
from jax import lax
from jax.experimental import pallas as pl
from jax.experimental.pallas import tpu as pltpu


def _round_up(x, m):
    return (x + m - 1) // m * m


def _make_kernel(tile, n_valid, n_padded):
    """Build the fused similarity + squared-error kernel for a given tiling."""
    needs_mask = n_padded > n_valid
    n_lane_chunks = tile // 128

    def kernel(adj_ref, hi_ref, hj_ref, out_ref):
        # Grid = (term, i, j); j is the reduction axis over column tiles.
        j = pl.program_id(2)

        @pl.when(j == 0)
        def _():
            out_ref[...] = jnp.zeros_like(out_ref)

        hi = hi_ref[...].astype(jnp.float32)            # [tile, Dp]
        hj = hj_ref[...].astype(jnp.float32)            # [tile, Dp]

        # Gram on the MXU, contracting the last (lane) dim of both operands —
        # avoids materializing hj.T.
        gram = lax.dot_general(
            hi, hj,
            dimension_numbers=(((1,), (1,)), ((), ())),
            preferred_element_type=jnp.float32)          # [tile, tile]

        sq_i = 0.5 * jnp.sum(hi * hi, axis=-1, keepdims=True)   # [tile, 1]
        sq_j = 0.5 * jnp.sum(hj * hj, axis=-1, keepdims=True)   # [tile, 1]

        # exp(-0.5 * ||xi - xj||^2), folded; min(.,0) == the d2 >= 0 floor.
        exponent = gram - sq_i - sq_j.reshape(1, tile)
        sim = jnp.exp(jnp.minimum(exponent, 0.0))

        diff = adj_ref[...].astype(jnp.float32) - sim

        if needs_mask:  # trace-time branch: only emitted when N was padded
            i = pl.program_id(1)
            row = lax.broadcasted_iota(jnp.int32, (tile, tile), 0) + i * tile
            col = lax.broadcasted_iota(jnp.int32, (tile, tile), 1) + j * tile
            diff = jnp.where((row < n_valid) & (col < n_valid), diff, 0.0)

        sq_err = diff * diff

        # Lane-parallel partial reduce: elementwise-add the 128-lane chunks
        # (pure VPU); the cross-lane/sublane reduce is deferred to JAX.
        partial = sq_err[:, 0:128]
        for c in range(1, n_lane_chunks):
            partial = partial + sq_err[:, c * 128:(c + 1) * 128]
        out_ref[...] += partial

    return kernel


def _fused_sq_err_sum(adj_stack, h_stack, tile, n_valid):
    """One pallas_call computing all three sum-of-squared-error terms.

    adj_stack: [3, Np, Np] f32, h_stack: [3, Np, Dp] f32.
    Returns the scalar sum over all three terms (before /N^2).
    """
    n_terms, n_padded, _ = adj_stack.shape
    dp = h_stack.shape[-1]
    gm = n_padded // tile
    gn = n_padded // tile

    kernel = _make_kernel(tile, n_valid, n_padded)

    grid_spec = pltpu.PrefetchScalarGridSpec(
        num_scalar_prefetch=0,
        grid=(n_terms, gm, gn),
        in_specs=[
            # adj tile for (term, i, j)
            pl.BlockSpec((pl.Squeezed(), tile, tile), lambda t, i, j: (t, i, j)),
            # h rows for the i (row) tile — full feature dim
            pl.BlockSpec((pl.Squeezed(), tile, dp), lambda t, i, j: (t, i, 0)),
            # h rows for the j (col) tile — full feature dim
            pl.BlockSpec((pl.Squeezed(), tile, dp), lambda t, i, j: (t, j, 0)),
        ],
        # Per-(term, row-block) lane-padded partial sums, resident across j.
        out_specs=pl.BlockSpec((pl.Squeezed(), pl.Squeezed(), tile, 128),
                               lambda t, i, j: (t, i, 0, 0)),
    )

    partials = pl.pallas_call(
        kernel,
        out_shape=jax.ShapeDtypeStruct((n_terms, gm, tile, 128), jnp.float32),
        grid_spec=grid_spec,
        compiler_params=pltpu.CompilerParams(
            dimension_semantics=("parallel", "parallel", "arbitrary")),
    )(adj_stack, h_stack, h_stack)

    return jnp.sum(partials)


def recon_loss(adj_v, adj_glo, h_v, h_v_glo, h, temperature=1.0, method="heat"):
    """JAX/Pallas equivalent of ReconLoss.forward (MSELoss reduction='mean')."""
    del temperature  # unused in the reference forward pass (see TODO above)
    assert method == "heat"

    n, d = h_v.shape
    # Tile choice: 128 keeps VMEM pressure low for small graphs; 256 fills the
    # 256-wide MXU on v6e/v7x for larger N. Re-derive if targeting v7x with
    # very large tiles (64 MiB physical VMEM).
    tile = 256 if n > 128 else 128
    n_padded = _round_up(max(n, tile), tile)
    d_padded = _round_up(max(d, 128), 128)

    def pad_h(x):
        return jnp.pad(x.astype(jnp.float32),
                       ((0, n_padded - n), (0, d_padded - d)))

    def pad_adj(a):
        return jnp.pad(a.astype(jnp.float32),
                       ((0, n_padded - n), (0, n_padded - n)))

    # Term order: (adj_v, h_v), (adj_glo, h_v_glo), (adj_glo, h). MSE is
    # symmetric, so term 3 (MSE(sim(h), adj_glo)) is identical.
    h_stack = jnp.stack([pad_h(h_v), pad_h(h_v_glo), pad_h(h)])
    adj_stack = jnp.stack([pad_adj(adj_v), pad_adj(adj_glo), pad_adj(adj_glo)])

    total = _fused_sq_err_sum(adj_stack, h_stack, tile, n)
    # All three MSE terms share the same 1/(N*N) denominator.
    return total / jnp.float32(n * n)


def _heat_sim_ref(x):
    """Pure-JAX reference of the heat-kernel similarity (sanity check)."""
    x = x.astype(jnp.float32)
    d2 = jnp.sum((x[:, None, :] - x[None, :, :]) ** 2, axis=-1)
    return jnp.exp(-0.5 * d2)


if __name__ == "__main__":
    # Small deterministic shapes: N nodes, D-dim embeddings.
    N, D = 16, 32
    key = jax.random.PRNGKey(0)
    k1, k2, k3, k4, k5 = jax.random.split(key, 5)

    h_v = jax.random.normal(k1, (N, D), dtype=jnp.float32) * 0.5
    h_v_glo = jax.random.normal(k2, (N, D), dtype=jnp.float32) * 0.5
    h = jax.random.normal(k3, (N, D), dtype=jnp.float32) * 0.5
    # "Target" adjacency matrices (synthetic, in [0, 1] like similarity matrices).
    adj_v = jax.nn.sigmoid(jax.random.normal(k4, (N, N), dtype=jnp.float32))
    adj_glo = jax.nn.sigmoid(jax.random.normal(k5, (N, N), dtype=jnp.float32))

    loss = recon_loss(adj_v, adj_glo, h_v, h_v_glo, h,
                      temperature=0.5, method="heat")
    loss = jax.block_until_ready(loss)

    # Cross-check against a pure-JAX reference implementation.
    ref = (
        jnp.mean((adj_v - _heat_sim_ref(h_v)) ** 2)
        + jnp.mean((adj_glo - _heat_sim_ref(h_v_glo)) ** 2)
        + jnp.mean((_heat_sim_ref(h) - adj_glo) ** 2)
    )
    assert jnp.allclose(loss, ref, atol=1e-5, rtol=1e-5), (loss, ref)

    print("KERNEL_OK")
</pallas_src>

<mosaic_0001>
module attributes {stable_mosaic.version = 11 : i64} {
  func.func @kernel(%arg0: i32, %arg1: i32, %arg2: i32, %arg3: memref<1x128x128xf32, #tpu.memory_space<vmem>>, %arg4: memref<1x128x128xf32, #tpu.memory_space<vmem>>, %arg5: memref<1x128x128xf32, #tpu.memory_space<vmem>>, %arg6: memref<1x1x128x128xf32, #tpu.memory_space<vmem>>) attributes {dimension_semantics = [#tpu.dimension_semantics<parallel>, #tpu.dimension_semantics<parallel>, #tpu.dimension_semantics<arbitrary>], iteration_bounds = array<i64: 3, 1, 1>, scalar_prefetch = 0 : i64, scratch_operands = 0 : i64, tpu.core_type = #tpu.core_type<tc>, window_params = [{transform_indices = @transform_0, window_bounds = array<i64: 1, 128, 128>}, {transform_indices = @transform_1, window_bounds = array<i64: 1, 128, 128>}, {transform_indices = @transform_2, window_bounds = array<i64: 1, 128, 128>}, {transform_indices = @transform_3, window_bounds = array<i64: 1, 1, 128, 128>}]} {
    %c0_i32 = arith.constant 0 : i32
    %0 = arith.cmpi eq, %arg2, %c0_i32 : i32
    %1 = arith.extui %0 : i1 to i32
    %c0_i32_0 = arith.constant 0 : i32
    %2 = arith.cmpi ne, %1, %c0_i32_0 : i32
    scf.if %2 {
      %cst_25 = arith.constant 0.000000e+00 : f32
      %51 = vector.broadcast %cst_25 : f32 to vector<128x128xf32>
      %c0_26 = arith.constant 0 : index
      %c0_27 = arith.constant 0 : index
      %c0_28 = arith.constant 0 : index
      %c0_29 = arith.constant 0 : index
      %52 = vector.load %arg6[%c0_26, %c0_27, %c0_28, %c0_29] : memref<1x1x128x128xf32, #tpu.memory_space<vmem>>, vector<1x1x128x128xf32>
      %53 = vector.shape_cast %52 : vector<1x1x128x128xf32> to vector<128x128xf32>
      %54 = vector.shape_cast %51 : vector<128x128xf32> to vector<1x1x128x128xf32>
      tpu.vector_store %arg6[%c0_26, %c0_27, %c0_28, %c0_29], %54 {strides = array<i32>} : memref<1x1x128x128xf32, #tpu.memory_space<vmem>>, vector<1x1x128x128xf32>,
    } else {
    }
    %c0 = arith.constant 0 : index
    %c0_1 = arith.constant 0 : index
    %c0_2 = arith.constant 0 : index
    %3 = vector.load %arg4[%c0, %c0_1, %c0_2] : memref<1x128x128xf32, #tpu.memory_space<vmem>>, vector<1x128x128xf32>
    %4 = vector.shape_cast %3 : vector<1x128x128xf32> to vector<128x128xf32>
    %c0_3 = arith.constant 0 : index
    %c0_4 = arith.constant 0 : index
    %c0_5 = arith.constant 0 : index
    %5 = vector.load %arg5[%c0_3, %c0_4, %c0_5] : memref<1x128x128xf32, #tpu.memory_space<vmem>>, vector<1x128x128xf32>
    %6 = vector.shape_cast %5 : vector<1x128x128xf32> to vector<128x128xf32>
    %cst = arith.constant dense<0.000000e+00> : vector<128x128xf32>
    %7 = tpu.matmul %4, %6, %cst {dimension_numbers = #tpu.dot_dimension_numbers<[1], [1], [0], [0], [0, 0, 1, 0], [], []>} : vector<128x128xf32>, vector<128x128xf32>, vector<128x128xf32> -> vector<128x128xf32>
    %8 = arith.mulf %4, %4 : vector<128x128xf32>
    %cst_6 = arith.constant dense<0.000000e+00> : vector<128xf32>
    %9 = vector.multi_reduction <add>, %8, %cst_6 [1] : vector<128x128xf32> to vector<128xf32>
    %10 = vector.shape_cast %9 : vector<128xf32> to vector<128x1xf32>
    %cst_7 = arith.constant 5.000000e-01 : f32
    %11 = vector.broadcast %cst_7 : f32 to vector<128x1xf32>
    %12 = arith.mulf %11, %10 : vector<128x1xf32>
    %13 = arith.mulf %6, %6 : vector<128x128xf32>
    %cst_8 = arith.constant dense<0.000000e+00> : vector<128xf32>
    %14 = vector.multi_reduction <add>, %13, %cst_8 [1] : vector<128x128xf32> to vector<128xf32>
    %15 = vector.shape_cast %14 : vector<128xf32> to vector<128x1xf32>
    %cst_9 = arith.constant 5.000000e-01 : f32
    %16 = vector.broadcast %cst_9 : f32 to vector<128x1xf32>
    %17 = arith.mulf %16, %15 : vector<128x1xf32>
    %18 = vector.broadcast %12 : vector<128x1xf32> to vector<128x128xf32>
    %19 = arith.subf %7, %18 : vector<128x128xf32>
    %20 = vector.shape_cast %17 : vector<128x1xf32> to vector<1x128xf32>
    %21 = vector.broadcast %20 : vector<1x128xf32> to vector<128x128xf32>
    %22 = arith.subf %19, %21 : vector<128x128xf32>
    %cst_10 = arith.constant 0.000000e+00 : f32
    %23 = vector.broadcast %cst_10 : f32 to vector<128x128xf32>
    %24 = arith.minimumf %22, %23 : vector<128x128xf32>
    %25 = math.exp %24 : vector<128x128xf32>
    %c0_11 = arith.constant 0 : index
    %c0_12 = arith.constant 0 : index
    %c0_13 = arith.constant 0 : index
    %26 = vector.load %arg3[%c0_11, %c0_12, %c0_13] : memref<1x128x128xf32, #tpu.memory_space<vmem>>, vector<1x128x128xf32>
    %27 = vector.shape_cast %26 : vector<1x128x128xf32> to vector<128x128xf32>
    %28 = arith.subf %27, %25 : vector<128x128xf32>
    %29 = tpu.iota {dimensions = array<i32: 0>} : vector<128x128xi32>
    %c128_i32 = arith.constant 128 : i32
    %30 = arith.muli %arg1, %c128_i32 : i32
    %31 = vector.broadcast %30 : i32 to vector<128x128xi32>
    %32 = arith.addi %29, %31 : vector<128x128xi32>
    %33 = tpu.iota {dimensions = array<i32: 1>} : vector<128x128xi32>
    %c128_i32_14 = arith.constant 128 : i32
    %34 = arith.muli %arg2, %c128_i32_14 : i32
    %35 = vector.broadcast %34 : i32 to vector<128x128xi32>
    %36 = arith.addi %33, %35 : vector<128x128xi32>
    %c16_i32 = arith.constant 16 : i32
    %37 = vector.broadcast %c16_i32 : i32 to vector<128x128xi32>
    %38 = arith.cmpi slt, %32, %37 : vector<128x128xi32>
    %c16_i32_15 = arith.constant 16 : i32
    %39 = vector.broadcast %c16_i32_15 : i32 to vector<128x128xi32>
    %40 = arith.cmpi slt, %36, %39 : vector<128x128xi32>
    %41 = arith.andi %38, %40 : vector<128x128xi1>
    %cst_16 = arith.constant 0.000000e+00 : f32
    %42 = vector.broadcast %cst_16 : f32 to vector<128x128xf32>
    %43 = arith.select %41, %28, %42 : vector<128x128xi1>, vector<128x128xf32>
    %44 = arith.mulf %43, %43 : vector<128x128xf32>
    %c0_17 = arith.constant 0 : index
    %c0_18 = arith.constant 0 : index
    %c0_19 = arith.constant 0 : index
    %c0_20 = arith.constant 0 : index
    %45 = vector.load %arg6[%c0_17, %c0_18, %c0_19, %c0_20] : memref<1x1x128x128xf32, #tpu.memory_space<vmem>>, vector<1x1x128x128xf32>
    %46 = vector.shape_cast %45 : vector<1x1x128x128xf32> to vector<128x128xf32>
    %47 = arith.addf %46, %44 : vector<128x128xf32>
    %c0_21 = arith.constant 0 : index
    %c0_22 = arith.constant 0 : index
    %c0_23 = arith.constant 0 : index
    %c0_24 = arith.constant 0 : index
    %48 = vector.load %arg6[%c0_21, %c0_22, %c0_23, %c0_24] : memref<1x1x128x128xf32, #tpu.memory_space<vmem>>, vector<1x1x128x128xf32>
    %49 = vector.shape_cast %48 : vector<1x1x128x128xf32> to vector<128x128xf32>
    %50 = vector.shape_cast %47 : vector<128x128xf32> to vector<1x1x128x128xf32>
    tpu.vector_store %arg6[%c0_21, %c0_22, %c0_23, %c0_24], %50 {strides = array<i32>} : memref<1x1x128x128xf32, #tpu.memory_space<vmem>>, vector<1x1x128x128xf32>,
    return
  }
  func.func @transform_0(%arg0: i32, %arg1: i32, %arg2: i32) -> (i32, i32, i32) {
    %c0_i32 = arith.constant 0 : i32
    return %arg0, %arg1, %arg2 : i32, i32, i32
  }
  func.func @transform_1(%arg0: i32, %arg1: i32, %arg2: i32) -> (i32, i32, i32) {
    %c0_i32 = arith.constant 0 : i32
    %c0_i32_0 = arith.constant 0 : i32
    return %arg0, %arg1, %c0_i32 : i32, i32, i32
  }
  func.func @transform_2(%arg0: i32, %arg1: i32, %arg2: i32) -> (i32, i32, i32) {
    %c0_i32 = arith.constant 0 : i32
    %c0_i32_0 = arith.constant 0 : i32
    return %arg0, %arg2, %c0_i32 : i32, i32, i32
  }
  func.func @transform_3(%arg0: i32, %arg1: i32, %arg2: i32) -> (i32, i32, i32, i32) {
    %c0_i32 = arith.constant 0 : i32
    %c0_i32_0 = arith.constant 0 : i32
    %c0_i32_1 = arith.constant 0 : i32
    return %arg0, %arg1, %c0_i32, %c0_i32_0 : i32, i32, i32, i32
  }
}

</mosaic_0001>

<bundles_post_ra>
// kernel: tpu_custom_call.1
= control target key start
LH: loop header
LB: loop body
LE: loop exit
PB: predicated region body
PF: predicated region fallthrough
CT: control target
= control target key end

     0   :  { %s2008_s0 = inlined_call_operand.hbm [shape: f32[3,128,128], index: 0, kind: input, shape index: {}]   ;;  %s2009_s1 = inlined_call_operand.hbm [shape: f32[3,128,128], index: 1, kind: input, shape index: {}]   ;;  %s2010_s2 = inlined_call_operand.hbm [shape: f32[3,128,128], index: 2, kind: input, shape index: {}]   ;;  %s2011_s3 = inlined_call_operand.hbm [shape: f32[3,1,128,128], index: 3, kind: output, shape index: {}]  }
   0x1   :  { %2017 = sst [smem:[#allocation15_spill]] %s2009_s1 }
   0x2   :  { %8 = vsyncpa [#allocation3], 0 }
   0x3   :  { %10 = vsyncpa [#allocation3 + $0x1], 0 }
   0x4   :  { %11 = vsyncpa [#allocation6], 0 }
   0x5   :  { %13 = vsyncpa [#allocation6 + $0x1], 0 }
   0x6   :  { %14 = vsyncpa [#allocation4], 0 }
   0x7   :  { %16 = vsyncpa [#allocation4 + $0x1], 0  ;;  %s1616_s12 = smov 0   ;;  %s1618_s13 = smov 0  }
   0x8   :  { %s1620_s14 = smov 0   ;;  %s1622_s15 = smov 0  }
   0x9   :  { %s1624_s16 = smov 0   ;;  %s1626_s17 = smov 0  }
   0xa LB: > { %2018 = sst [smem:[#allocation12_spill]] %s1581_s16  ;;  %s1647_s18 = sadd.s32 4294967295, %s1585_s17   ;;  %s1585_s17 = sphi %s1626_s17, %s22_s17   ;;  %s1581_s16 = sphi %s1624_s16, %s2032_s16   ;;  %s1577_s15 = sphi %s1622_s15, %s2031_s15   ;;  %s1573_s14 = sphi %s1620_s14, %s2035_s14   ;;  %s1569_s13 = sphi %s1618_s13, %s2034_s13   ;;  %s1565_s12 = sphi %s1616_s12, %s2033_s12  }
   0xb   : > { %s1190_s19 = sadd.s32 4294967294, %s1585_s17   ;;  %s41_s20 = sadd.s32 1, %s1581_s16 }
   0xc   : > { %s52_s21 = sadd.s32 1, %s1573_s14  ;;  %p43_p0 = scmp.ge.s32.totalorder %s41_s20, 3 }
   0xd   : > { %p59_p1 = scmp.ne.s32.totalorder %s1573_s14, %s1569_s13  ;;  %p60_p2 = scmp.eq.s32.totalorder %s1585_s17, 0 }
   0xe   : > { %p65_p3 = scmp.ne.s32.totalorder %s1569_s13, %s1565_s12  ;;  %s2037_s20 = smov (%p43_p0, %s41_s20), 0 }
   0xf   : > { %2019 = sst [smem:[#allocation13_spill]] %s2037_s20  ;;  %p1659_p4 = por %p60_p2, %p59_p1 }
  0x10   : > { %p66_p5 = scmp.eq.s32.totalorder %s1647_s18, 0  ;;  %s45_s23 = ssub.s32 %s1581_s16, %s2037_s20 }
  0x11   : > { %p147_p6 = scmp.eq.s32.totalorder %s1647_s18, 2  ;;  %p50_p7 = scmp.eq.s32.totalorder %s45_s23, 0 }
  0x12   : > { %p1667_p8 = por %p66_p5, %p65_p3  ;;  %p153_p10 = scmp.eq.s32.totalorder %s1190_s19, 2 }
  0x13   : > { %p1671_p9 = por %p147_p6, %p59_p1  ;;  %p1358_p12 = scmp.lt.s32.totalorder %s1585_s17, 3 }
  0x14   : > { %s1676_s26 = scalar_select %p50_p7, %s1573_s14, %s52_s21  }
  0x15   : > { %p1678_p11 = por %p153_p10, %p65_p3  ;;  %s2012_s28 = sand.u32 1, %s1573_s14  }
  0x16   : > { %2023 = sst [smem:[#allocation14_spill]] %s1676_s26  ;;  %s1686_s29 = sshll.u32 %s2012_s28, 7 }
  0x17   : > { %s1689_s30 = sshll.u32 %s1581_s16, 11  ;;  %p1693_p13 = pnand %p1358_p12, %p1659_p4 }
  0x18   : > { %s197_s5 = sand.u32 1, %s1585_s17   ;;  %s2026_s1 = sld [smem:[#allocation15_spill]] }
  0x19   : > { %s201_s9 = scalar_lea.vmem [#allocation5], %s1686_s29  ;;  %p1202_p0 = scmp.ge.s32.totalorder %s1585_s17, 1 }
  0x1a   : > { %s210_s10 = sshll.u32 %s201_s9, 4  ;;  %p241_p1 = scmp.lt.s32.totalorder %s1585_s17, 4  ;;  %s211_s10 = int_to_ptr.vmem [resolvable:$true] %s210_s10 }
  0x1b   : > { %s1705_s11 = scalar_lea.sflag [#allocation6], %s197_s5  ;;  %p1419_p2 = pneg %p1693_p13 }
  0x1c   : > { %s1430_s19 = scalar_lea.vmem %s211_s10, 2048  ;;  %s1587_s21 = smov [#allocation5]  }
  0x1d   : > { %p1431_p3 = scmp.ne.s32.totalorder %s211_s10, %s1430_s19  ;;  %s1435_s22 = sshll.u32 %s1587_s21, 4  ;;  %s1436_s22 = int_to_ptr.vmem [resolvable:$false] %s1435_s22 }
  0x1e   : > { %s209_s8 = scalar_lea.hbm %s2026_s1, %s1689_s30  ;;  %s1437_s23 = scalar_lea.vmem %s1436_s22, 4096 }
  0x1f   : > { %p1433_p4 = pnand %p1431_p3, %p1419_p2  ;;  %p1438_p6 = scmp.lt.s32.totalorder %s211_s10, %s1436_s22 }
  0x20   : > { %p1439_p7 = scmp.lt.s32.totalorder %s1437_s23, %s1430_s19 }
  0x21   : > { %p1434_p5 = pneg %p1433_p4 }
  0x22   : > { %p1440_p10 = por %p1439_p7, %p1438_p6 }
  0x24   : > { %p1441_p12 = pnand %p1440_p10, %p1434_p5 }
  0x26   : > { %1444 = shalt.err (!%p1441_p12)
}
  0x27   : > { %s2015_s6 = smov 128   ;;  %s1589_s5 = smov 8  }
  0x28   : > { %1350 = dma.hbm_to_vmem [thread:$0]  (!%p1693_p13), %s209_s8, 2048, %s211_s10, %s1705_s11, %s2015_s6, %s2015_s6, %s1589_s5  }
  0x29   : > { %p1722_p3 = pnand %p1202_p0, %p241_p1  ;;  %s186_s21 = scalar_lea.hbm %s2008_s0, %s1689_s30 }
  0x2a   : > { %s177_s22 = scalar_lea.vmem [#allocation2], %s1686_s29  ;;  %s232_s20 = scalar_lea.hbm %s2010_s2, %s1689_s30 }
  0x2b   : > { %s187_s23 = sshll.u32 %s177_s22, 4  ;;  %s2028_s16 = sand.u32 1, %s1573_s14   ;;  %s188_s23 = int_to_ptr.vmem [resolvable:$true] %s187_s23 }
  0x2c   : > { %s174_s26 = scalar_lea.sflag [#allocation3], %s2028_s16  ;;  %s1458_s8 = scalar_lea.vmem %s188_s23, 2048 }
  0x2d   : > { %p1459_p4 = scmp.ne.s32.totalorder %s188_s23, %s1458_s8  ;;  %s1590_s10 = smov [#allocation2]  }
  0x2e   : > { %s1463_s6 = sshll.u32 %s1590_s10, 4  ;;  %s1464_s6 = int_to_ptr.vmem [resolvable:$false] %s1463_s6 }
  0x2f   : > { %p1461_p0 = pnand %p1459_p4, %p1419_p2  ;;  %s1465_s9 = scalar_lea.vmem %s1464_s6, 4096 }
  0x30   : > { %p1466_p5 = scmp.lt.s32.totalorder %s188_s23, %s1464_s6  ;;  %p1467_p6 = scmp.lt.s32.totalorder %s1465_s9, %s1458_s8 }
  0x31   : > { %p1462_p1 = pneg %p1461_p0 }
  0x32   : > { %p1468_p7 = por %p1467_p6, %p1466_p5 }
  0x34   : > { %p1469_p10 = pnand %p1468_p7, %p1462_p1 }
  0x36   : > { %1472 = shalt.err (!%p1469_p10)
}
  0x37   : > { %s2029_s1 = smov 128   ;;  %s224_s16 = scalar_lea.vmem [#allocation7], %s1686_s29 }
  0x38   : > { %1347 = dma.hbm_to_vmem [thread:$0]  (!%p1693_p13), %s186_s21, 2048, %s188_s23, %s174_s26, %s2029_s1, %s2029_s1, %s1589_s5  }
  0x39   : > { %s233_s28 = sshll.u32 %s224_s16, 4  ;;  %s1591_s6 = smov [#allocation7]   ;;  %s234_s28 = int_to_ptr.vmem [resolvable:$true] %s233_s28 }
  0x3a   : > { %s1486_s19 = scalar_lea.vmem %s234_s28, 2048  ;;  %s1491_s22 = sshll.u32 %s1591_s6, 4  ;;  %s1492_s22 = int_to_ptr.vmem [resolvable:$false] %s1491_s22 }
  0x3b   : > { %p1487_p12 = scmp.ne.s32.totalorder %s234_s28, %s1486_s19  ;;  %s1493_s8 = scalar_lea.vmem %s1492_s22, 4096 }
  0x3c   : > { %p1494_p1 = scmp.lt.s32.totalorder %s234_s28, %s1492_s22  ;;  %p1495_p5 = scmp.lt.s32.totalorder %s1493_s8, %s1486_s19 }
  0x3d   : > { %p1489_p4 = pnand %p1487_p12, %p1419_p2 }
  0x3e   : > { %p1496_p6 = por %p1495_p5, %p1494_p1 }
  0x3f   : > { %p1490_p0 = pneg %p1489_p4 }
  0x41   : > { %p1497_p7 = pnand %p1496_p6, %p1490_p0 }
  0x43   : > { %1500 = shalt.err (!%p1497_p7)
}
  0x44   : > { %1353 = dma.hbm_to_vmem [thread:$0]  (!%p1693_p13), %s232_s20, 2048, %s234_s28, %s1705_s11, %s2029_s1, %s2029_s1, %s1589_s5  }
  0x45   : > { %245 = sbr.rel (%p1722_p3) target bundleno = 380 (0x17c), region = 32  ;;  %s1763_s21 = sand.u32 (!%p1722_p3), 1, %s1569_s13  }
  0x46   : > { %s1766_s4 = sshll.u32 (!%p1722_p3), %s1763_s21, 7  ;;  %s248_s23 = scalar_lea.sflag (!%p1722_p3), [#allocation3], %s1763_s21 }
  0x47   : > { %s251_s10 = scalar_lea.vmem (!%p1722_p3), [#allocation2], %s1766_s4 }
  0x4a   : > { %1552 = dma.done.wait (%p1667_p8), %s248_s23, 2048  }
  0x4b   : > { %1554 = vsyncadd (%p1667_p8), %s248_s23, 4294965248  ;;  %s256_s20 = sand.u32 1, %s1647_s18   ;;  %s1776_s11 = scalar_lea.vmem [#allocation5], %s1766_s4 }
  0x4c   : > { %s257_s30 = scalar_lea.sflag [#allocation6], %s256_s20 }
  0x4d   : > { %1556 = dma.done.wait (%p1667_p8), %s257_s30, 4096  }
  0x4e   : > { %1558 = vsyncadd (%p1667_p8), %s257_s30, 4294963200  ;;  %s1783_s5 = scalar_lea.vmem [#allocation7], %s1766_s4  ;;  %v1807_v5 = vld [vmem:[%s1776_s11] sm:$0xff]  ;;  %v326_v34 = vld [vmem:[%s1776_s11 + $0x8] sm:$0xff]  ;;  %s1872_s18 = scalar_lea.vmem [#allocation8], %s1766_s4  ;;  %v1592_v37 = vmov 0.0   ;;  %v662_v51 = vlaneseq }
  0x4f   : > { %v1786_v0 = vld [vmem:[%s1783_s5 + $0x78] sm:$0xff]  ;;  %v1789_v1 = vld [vmem:[%s1783_s5 + $0x70] sm:$0xff]  ;;  %v1798_v2 = vld [vmem:[%s1783_s5 + $0x68] sm:$0xff]  ;;  %1280 = vmatprep.mubr.f32.mxu0 %v1807_v5  ;;  %v502_v35 = vmul.f32 %v1807_v5, %v1807_v5  ;;  %v503_v36 = vmul.f32 %v326_v34, %v326_v34  ;;  %1019 = vst [vmem:[%s1872_s18 + $0x10] sm:$0xff] %v1592_v37  ;;  %vm673_vm0 = vcmask 130112   ;;  %vm680_vm1 = vcmask 195712  }
  0x50   : > { %1248 = vmatprep.subr.mxu0 %v1786_v0  ;;  %1304 = vmatprep.subr.mxu1 %v1786_v0  ;;  %v1801_v3 = vld [vmem:[%s1783_s5 + $0x10] sm:$0xff]  ;;  %v1804_v4 = vld [vmem:[%s1783_s5] sm:$0xff]  ;;  %v1819_v9 = vld [vmem:[%s1783_s5 + $0x8] sm:$0xff]  ;;  %v579_v31 = vmul.f32 %v1798_v2, %v1798_v2  ;;  %v580_v32 = vmul.f32 %v1789_v1, %v1789_v1  ;;  %v581_v33 = vmul.f32 %v1786_v0, %v1786_v0  ;;  %v1911_v52 = vand.u32 127, %v662_v51  ;;  %s1215_s24 = sshll.u32 %s1577_s15, 11  ;;  %s1049_s7 = sshll.u32 %s1872_s18, 4  ;;  %s1959_s7 = int_to_ptr.vmem [resolvable:$true] %s1049_s7 }
  0x51   : > { %1249 = vmatpush3.xpose.msra.mxu0 %v1786_v0  ;;  %1320 = vmatpush3.xpose.msra.mxu1 %v1786_v0  ;;  %v568_v6 = vmul.f32 %v1801_v3, %v1801_v3  ;;  %v566_v7 = vmul.f32 %v1804_v4, %v1804_v4  ;;  %v333_v8 = vld [vmem:[%s1776_s11 + $0x40] sm:$0xff]  ;;  %v1823_v11 = vld [vmem:[%s1783_s5 + $0x18] sm:$0xff]  ;;  %v567_v12 = vmul.f32 %v1819_v9, %v1819_v9  ;;  %v1837_v16 = vld [vmem:[%s1783_s5 + $0x28] sm:$0xff]  ;;  %v1913_v54 = vshrl.u32 %v662_v51, 7  ;;  %s1957_s16 = scalar_lea.hbm %s2011_s3, %s1215_s24  ;;  %s1034_s28 = scalar_lea.sflag [#allocation4], %s1763_s21 }
  0x52   : > { %1250 = vmatprep.subr.mxu0 %v1789_v1  ;;  %1305 = vmatprep.subr.mxu1 %v1789_v1  ;;  %v353_v10 = vld [vmem:[%s1783_s5 + $0x60] sm:$0xff]  ;;  %v569_v13 = vmul.f32 %v1823_v11, %v1823_v11  ;;  %v352_v15 = vld [vmem:[%s1783_s5 + $0x58] sm:$0xff]  ;;  %v571_v18 = vmul.f32 %v1837_v16, %v1837_v16  ;;  %v347_v19 = vld [vmem:[%s1783_s5 + $0x30] sm:$0xff]  ;;  %1020 = vst [vmem:[%s1872_s18 + $0x18] sm:$0xff] %v1592_v37  ;;  %v668_v56 = vadd.s32 4294967288, %v1911_v52  ;;  %v675_v57 = vadd.s32 4294967280, %v1911_v52 }
  0x53   : > { %582 = vadd.xlane.f32.xlu0 %v566_v7  ;;  %586 = vadd.xlane.f32.xlu1 %v568_v6  ;;  %v1833_v14 = vld [vmem:[%s1783_s5 + $0x20] sm:$0xff]  ;;  %v351_v20 = vld [vmem:[%s1783_s5 + $0x50] sm:$0xff]  ;;  %v348_v21 = vld [vmem:[%s1783_s5 + $0x38] sm:$0xff]  ;;  %v572_v22 = vmul.f32 %v347_v19, %v347_v19  ;;  %v577_v29 = vmul.f32 %v352_v15, %v352_v15  ;;  %v578_v30 = vmul.f32 %v353_v10, %v353_v10  ;;  %v682_v63 = vadd.s32 4294967272, %v1911_v52  ;;  %s1501_s19 = scalar_lea.vmem %s1959_s7, 2048  ;;  %s1593_s15 = smov [#allocation8]  }
  0x54   : > { %1292 = vmatprep.mubr.f32.mxu1 %v333_v8  ;;  %v570_v17 = vmul.f32 %v1833_v14, %v1833_v14  ;;  %v573_v23 = vmul.f32 %v348_v21, %v348_v21  ;;  %v349_v24 = vld [vmem:[%s1783_s5 + $0x40] sm:$0xff]  ;;  %v350_v25 = vld [vmem:[%s1783_s5 + $0x48] sm:$0xff]  ;;  %v576_v28 = vmul.f32 %v351_v20, %v351_v20  ;;  %1021 = vst [vmem:[%s1872_s18 + $0x20] sm:$0xff] %v1592_v37  ;;  %1022 = vst [vmem:[%s1872_s18 + $0x28] sm:$0xff] %v1592_v37  ;;  %vm687_vm2 = vcmask 261312   ;;  %p1502_p8 = scmp.ne.s32.totalorder %s1959_s7, %s1501_s19  ;;  %s1505_s6 = sshll.u32 %s1593_s15, 4  ;;  %s1506_s6 = int_to_ptr.vmem [resolvable:$false] %s1505_s6 }
  0x55   : > { %1251 = vmatpush3.xpose.msra.mxu0 %v1789_v1  ;;  %1321 = vmatpush3.xpose.msra.mxu1 %v1789_v1  ;;  %v574_v26 = vmul.f32 %v349_v24, %v349_v24  ;;  %v575_v27 = vmul.f32 %v350_v25, %v350_v25  ;;  %1023 = vst [vmem:[%s1872_s18 + $0x30] sm:$0xff] %v1592_v37  ;;  %1024 = vst [vmem:[%s1872_s18 + $0x38] sm:$0xff] %v1592_v37  ;;  %v334_v38 = vld [vmem:[%s1776_s11 + $0x48] sm:$0xff]  ;;  %v327_v39 = vld [vmem:[%s1776_s11 + $0x10] sm:$0xff]  ;;  %v689_v5 = vadd.s32 4294967264, %v1911_v52  ;;  %vm694_vm3 = vcmask 326912   ;;  %p1508_p3 = scmp.lt.s32.totalorder %s1959_s7, %s1506_s6 }
  0x56   : > { %1252 = vmatprep.subr.mxu0 %v1798_v2  ;;  %1306 = vmatprep.subr.mxu1 %v1798_v2  ;;  %1025 = vst [vmem:[%s1872_s18 + $0x40] sm:$0xff] %v1592_v37  ;;  %1026 = vst [vmem:[%s1872_s18 + $0x48] sm:$0xff] %v1592_v37  ;;  %v335_v40 = vld [vmem:[%s1776_s11 + $0x50] sm:$0xff]  ;;  %v328_v41 = vld [vmem:[%s1776_s11 + $0x18] sm:$0xff]  ;;  %v666_v59 = vsub.s32 %v1911_v52, %v1913_v54  ;;  %v671_v61 = vsub.s32 %v668_v56, %v1913_v54  ;;  %vm701_vm4 = vcmask 392512   ;;  %vm708_vm5 = vcmask 458112   ;;  %p1503_p13 = pnand %p1502_p8, %p1671_p9 }
  0x57   : > { %584 = vadd.xlane.f32.xlu0 %v567_v12  ;;  %588 = vadd.xlane.f32.xlu1 %v569_v13  ;;  %1027 = vst [vmem:[%s1872_s18 + $0x50] sm:$0xff] %v1592_v37  ;;  %1028 = vst [vmem:[%s1872_s18 + $0x58] sm:$0xff] %v1592_v37  ;;  %v336_v42 = vld [vmem:[%s1776_s11 + $0x58] sm:$0xff]  ;;  %v329_v43 = vld [vmem:[%s1776_s11 + $0x20] sm:$0xff]  ;;  %v678_v1 = vsub.s32 %v675_v57, %v1913_v54  ;;  %v685_v6 = vsub.s32 %v682_v63, %v1913_v54  ;;  %vm715_vm6 = vcmask 523712   ;;  %vm722_vm7 = vcmask 589312  }
  0x58   : > { %1029 = vst [vmem:[%s1872_s18 + $0x60] sm:$0xff] %v1592_v37  ;;  %1030 = vst [vmem:[%s1872_s18 + $0x68] sm:$0xff] %v1592_v37  ;;  %v337_v44 = vld [vmem:[%s1776_s11 + $0x60] sm:$0xff]  ;;  %v330_v45 = vld [vmem:[%s1776_s11 + $0x28] sm:$0xff]  ;;  %v692_v13 = vsub.s32 %v689_v5, %v1913_v54  ;;  %vm729_vm8 = vcmask 654912   ;;  %vm736_vm9 = vcmask 720512   ;;  %p1504_p2 = pneg %p1503_p13 }
  0x59   : > { %1253 = vmatpush3.xpose.msra.mxu0 %v1798_v2  ;;  %1322 = vmatpush3.xpose.msra.mxu1 %v1798_v2  ;;  %1031 = vst [vmem:[%s1872_s18 + $0x70] sm:$0xff] %v1592_v37  ;;  %1032 = vst [vmem:[%s1872_s18 + $0x78] sm:$0xff] %v1592_v37  ;;  %v338_v46 = vld [vmem:[%s1776_s11 + $0x68] sm:$0xff]  ;;  %v331_v47 = vld [vmem:[%s1776_s11 + $0x30] sm:$0xff]  ;;  %vm743_vm10 = vcmask 786112   ;;  %vm750_vm11 = vcmask 851712  }
  0x5a   : > { %1254 = vmatprep.subr.mxu0 %v353_v10  ;;  %1307 = vmatprep.subr.mxu1 %v353_v10  ;;  %v339_v48 = vld [vmem:[%s1776_s11 + $0x70] sm:$0xff]  ;;  %v332_v49 = vld [vmem:[%s1776_s11 + $0x38] sm:$0xff]  ;;  %vm757_vm12 = vcmask 917312   ;;  %vm764_vm13 = vcmask 982912   ;;  %vm771_vm14 = vcmask 1048512   ;;  %vm936_vm15 = vcmp.lt.s32.totalorder %v1911_v52, 16 }
  0x5b   : > { %590 = vadd.xlane.f32.xlu0 %v570_v17  ;;  %592 = vadd.xlane.f32.xlu1 %v571_v18  ;;  %v340_v50 = vld [vmem:[%s1776_s11 + $0x78] sm:$0xff]  ;;  %v703_v17 = vadd.s32 4294967248, %v1911_v52  ;;  %s1507_s22 = scalar_lea.vmem %s1506_s6, 4096 }
  0x5c   : > { %p1509_p10 = scmp.lt.s32.totalorder %s1507_s22, %s1501_s19 }
  0x5d   : > { %1255 = vmatpush3.xpose.msra.mxu0 %v353_v10  ;;  %1323 = vmatpush3.xpose.msra.mxu1 %v353_v10 }
  0x5e   : > { %1256 = vmatprep.subr.mxu0 %v352_v15  ;;  %1308 = vmatprep.subr.mxu1 %v352_v15  ;;  %p1510_p12 = por %p1509_p10, %p1508_p3 }
  0x5f   : > { %594 = vadd.xlane.f32.xlu0 %v572_v22  ;;  %596 = vadd.xlane.f32.xlu1 %v573_v23  ;;  %v710_v23 = vadd.s32 4294967240, %v1911_v52 }
  0x60   : > { %p1511_p4 = pnand %p1510_p12, %p1504_p2 }
  0x61   : > { %1257 = vmatpush3.xpose.msra.mxu0 %v352_v15  ;;  %1324 = vmatpush3.xpose.msra.mxu1 %v352_v15 }
  0x62   : > { %1258 = vmatprep.subr.mxu0 %v351_v20  ;;  %1309 = vmatprep.subr.mxu1 %v351_v20 }
  0x63   : > { %598 = vadd.xlane.f32.xlu0 %v574_v26  ;;  %600 = vadd.xlane.f32.xlu1 %v575_v27 }
  0x65   : > { %1259 = vmatpush3.xpose.msra.mxu0 %v351_v20  ;;  %1325 = vmatpush3.xpose.msra.mxu1 %v351_v20 }
  0x66   : > { %1260 = vmatprep.subr.mxu0 %v350_v25  ;;  %1310 = vmatprep.subr.mxu1 %v350_v25 }
  0x67   : > { %602 = vadd.xlane.f32.xlu0 %v576_v28  ;;  %604 = vadd.xlane.f32.xlu1 %v577_v29  ;;  %v717_v29 = vadd.s32 4294967232, %v1911_v52 }
  0x69   : > { %1261 = vmatpush3.xpose.msra.mxu0 %v350_v25  ;;  %1326 = vmatpush3.xpose.msra.mxu1 %v350_v25  ;;  %v706_v25 = vsub.s32 %v703_v17, %v1913_v54  ;;  %v720_v37 = vsub.s32 %v717_v29, %v1913_v54 }
  0x6a   : > { %1262 = vmatprep.subr.mxu0 %v349_v24  ;;  %1311 = vmatprep.subr.mxu1 %v349_v24 }
  0x6b   : > { %606 = vadd.xlane.f32.xlu0 %v578_v30  ;;  %608 = vadd.xlane.f32.xlu1 %v579_v31  ;;  %v713_v30 = vsub.s32 %v710_v23, %v1913_v54 }
  0x6d   : > { %1263 = vmatpush3.xpose.msra.mxu0 %v349_v24  ;;  %1327 = vmatpush3.xpose.msra.mxu1 %v349_v24 }
  0x6e   : > { %1264 = vmatprep.subr.mxu0 %v348_v21  ;;  %1312 = vmatprep.subr.mxu1 %v348_v21 }
  0x6f   : > { %610 = vadd.xlane.f32.xlu0 %v580_v32  ;;  %612 = vadd.xlane.f32.xlu1 %v581_v33 }
  0x71   : > { %1265 = vmatpush3.xpose.msra.mxu0 %v348_v21  ;;  %1328 = vmatpush3.xpose.msra.mxu1 %v348_v21 }
  0x72   : > { %1266 = vmatprep.subr.mxu0 %v347_v19  ;;  %1313 = vmatprep.subr.mxu1 %v347_v19 }
  0x73   : > { %518 = vadd.xlane.f32.xlu0 %v502_v35  ;;  %520 = vadd.xlane.f32.xlu1 %v503_v36  ;;  %v724_v35 = vadd.s32 4294967224, %v1911_v52 }
  0x75   : > { %1267 = vmatpush3.xpose.msra.mxu0 %v347_v19  ;;  %1329 = vmatpush3.xpose.msra.mxu1 %v347_v19 }
  0x76   : > { %1268 = vmatprep.subr.mxu0 %v1837_v16  ;;  %1314 = vmatprep.subr.mxu1 %v1837_v16 }
  0x79   : > { %1269 = vmatpush3.xpose.msra.mxu0 %v1837_v16  ;;  %1330 = vmatpush3.xpose.msra.mxu1 %v1837_v16 }
  0x7a   : > { %1270 = vmatprep.subr.mxu0 %v1833_v14  ;;  %1315 = vmatprep.subr.mxu1 %v1833_v14 }
  0x7d   : > { %1271 = vmatpush3.xpose.msra.mxu0 %v1833_v14  ;;  %1331 = vmatpush3.xpose.msra.mxu1 %v1833_v14 }
  0x7e   : > { %1272 = vmatprep.subr.mxu0 %v1823_v11  ;;  %1316 = vmatprep.subr.mxu1 %v1823_v11 }
  0x81   : > { %1273 = vmatpush3.xpose.msra.mxu0 %v1823_v11  ;;  %1332 = vmatpush3.xpose.msra.mxu1 %v1823_v11  ;;  %v696_v11 = vadd.s32 4294967256, %v1911_v52 }
  0x82   : > { %1274 = vmatprep.subr.mxu0 %v1801_v3  ;;  %1317 = vmatprep.subr.mxu1 %v1801_v3 }
  0x83   : > { %v699_v18 = vsub.s32 %v696_v11, %v1913_v54 }
  0x85   : > { %1275 = vmatpush3.xpose.msra.mxu0 %v1801_v3  ;;  %1333 = vmatpush3.xpose.msra.mxu1 %v1801_v3 }
  0x86   : > { %1276 = vmatprep.subr.mxu0 %v1819_v9  ;;  %1318 = vmatprep.subr.mxu1 %v1819_v9 }
  0x89   : > { %1277 = vmatpush3.xpose.msra.mxu0 %v1819_v9  ;;  %1334 = vmatpush3.xpose.msra.mxu1 %v1819_v9 }
  0x8a   : > { %1278 = vmatprep.subr.mxu0 %v1804_v4  ;;  %1319 = vmatprep.subr.mxu1 %v1804_v4 }
  0x8d   : > { %1279 = vmatpush3.xpose.msra.mxu0 %v1804_v4  ;;  %1335 = vmatpush3.xpose.msra.mxu1 %v1804_v4 }
  0x90   : > { %1281 = vmatmul.mubr.f32.vlgmr.msra.gmra.mxu0 %v326_v34  ;;  %1293 = vmatmul.mubr.f32.vlgmr.msra.gmra.mxu1 %v334_v38 }
  0x91   : > { %1283 = vmatprep.mubr.f32.mxu0 %v327_v39  ;;  %1295 = vmatprep.mubr.f32.mxu1 %v335_v40 }
  0x94   : > { %1284 = vmatmul.mubr.f32.gmra.mxu0 %v328_v41  ;;  %1296 = vmatmul.mubr.f32.gmra.mxu1 %v336_v42  ;;  %v731_v41 = vadd.s32 4294967216, %v1911_v52  ;;  %v727_v42 = vsub.s32 %v724_v35, %v1913_v54 }
  0x95   : > { %1286 = vmatprep.mubr.f32.mxu0 %v329_v43  ;;  %1298 = vmatprep.mubr.f32.mxu1 %v337_v44 }
  0x98   : > { %1287 = vmatmul.mubr.f32.gmra.mxu0 %v330_v45  ;;  %1299 = vmatmul.mubr.f32.gmra.mxu1 %v338_v46 }
  0x99   : > { %1289 = vmatprep.mubr.f32.mxu0 %v331_v47  ;;  %1301 = vmatprep.mubr.f32.mxu1 %v339_v48  ;;  %v738_v47 = vadd.s32 4294967208, %v1911_v52 }
  0x9b   : > { %v741_v56 = vsub.s32 %v738_v47, %v1913_v54 }
  0x9c   : > { %1290 = vmatmul.mubr.f32.gmra.mxu0 %v332_v49  ;;  %1302 = vmatmul.mubr.f32.gmra.mxu1 %v340_v50  ;;  %v734_v49 = vsub.s32 %v731_v41, %v1913_v54 }
  0xdc   : > { %v583_v53 = vpop.xlane.xlu0 %582  ;;  %v587_v55 = vpop.xlane.xlu1 %586 }
  0xdd   : > { %v614_v60 = vmul.f32 0.5, %v583_v53  ;;  %v616_v2 = vmul.f32 0.5, %v587_v55  ;;  %v745_v55 = vadd.s32 4294967200, %v1911_v52 }
  0xdf   : > { %v667_v3 = vrot.slane %v614_v60, %v666_v59  ;;  %v679_v9 = vrot.slane %v616_v2, %v678_v1  ;;  %v748_v63 = vsub.s32 %v745_v55, %v1913_v54 }
  0xe0   : > { %v585_v58 = vpop.xlane.xlu0 %584  ;;  %v589_v0 = vpop.xlane.xlu1 %588 }
  0xe1   : > { %v615_v62 = vmul.f32 0.5, %v585_v58  ;;  %v617_v7 = vmul.f32 0.5, %v589_v0 }
  0xe3   : > { %v672_v4 = vrot.slane %v615_v62, %v671_v61  ;;  %v686_v15 = vrot.slane %v617_v7, %v685_v6  ;;  %v752_v61 = vadd.s32 4294967192, %v1911_v52 }
  0xe4   : > { %v591_v8 = vpop.xlane.xlu0 %590  ;;  %v593_v12 = vpop.xlane.xlu1 %592 }
  0xe5   : > { %v674_v10 = vsel %vm673_vm0, %v672_v4, %v667_v3  ;;  %v618_v14 = vmul.f32 0.5, %v591_v8  ;;  %v619_v19 = vmul.f32 0.5, %v593_v12  ;;  %v759_v3 = vadd.s32 4294967184, %v1911_v52 }
  0xe6   : > { %v681_v16 = vsel %vm680_vm1, %v679_v9, %v674_v10  ;;  %v755_v4 = vsub.s32 %v752_v61, %v1913_v54  ;;  %v766_v9 = vadd.s32 4294967176, %v1911_v52 }
  0xe7   : > { %v693_v21 = vrot.slane %v618_v14, %v692_v13  ;;  %v688_v22 = vsel %vm687_vm2, %v686_v15, %v681_v16  ;;  %v700_v27 = vrot.slane %v619_v19, %v699_v18  ;;  %v762_v11 = vsub.s32 %v759_v3, %v1913_v54 }
  0xe8   : > { %v595_v20 = vpop.xlane.xlu0 %594  ;;  %v597_v24 = vpop.xlane.xlu1 %596  ;;  %v769_v15 = vsub.s32 %v766_v9, %v1913_v54 }
  0xe9   : > { %v620_v26 = vmul.f32 0.5, %v595_v20  ;;  %v695_v28 = vsel %vm694_vm3, %v693_v21, %v688_v22  ;;  %v621_v31 = vmul.f32 0.5, %v597_v24 }
  0xea   : > { %v702_v34 = vsel %vm701_vm4, %v700_v27, %v695_v28 }
  0xeb   : > { %v707_v33 = vrot.slane %v620_v26, %v706_v25  ;;  %v714_v39 = vrot.slane %v621_v31, %v713_v30 }
  0xec   : > { %v599_v32 = vpop.xlane.xlu0 %598  ;;  %v601_v36 = vpop.xlane.xlu1 %600 }
  0xed   : > { %v622_v38 = vmul.f32 0.5, %v599_v32  ;;  %v709_v40 = vsel %vm708_vm5, %v707_v33, %v702_v34  ;;  %v623_v43 = vmul.f32 0.5, %v601_v36 }
  0xee   : > { %v716_v46 = vsel %vm715_vm6, %v714_v39, %v709_v40 }
  0xef   : > { %v721_v45 = vrot.slane %v622_v38, %v720_v37  ;;  %v728_v51 = vrot.slane %v623_v43, %v727_v42 }
  0xf0   : > { %v603_v44 = vpop.xlane.xlu0 %602  ;;  %v605_v48 = vpop.xlane.xlu1 %604 }
  0xf1   : > { %v624_v50 = vmul.f32 0.5, %v603_v44  ;;  %v723_v53 = vsel %vm722_vm7, %v721_v45, %v716_v46  ;;  %v625_v57 = vmul.f32 0.5, %v605_v48 }
  0xf2   : > { %v730_v60 = vsel %vm729_vm8, %v728_v51, %v723_v53  ;;  %v850_v51 = vld [vmem:[%s251_s10] sm:$0xff] }
  0xf3   : > { %v735_v59 = vrot.slane %v624_v50, %v734_v49  ;;  %v742_v1 = vrot.slane %v625_v57, %v741_v56  ;;  %v851_v49 = vld [vmem:[%s251_s10 + $0x8] sm:$0xff] }
  0xf4   : > { %v607_v58 = vpop.xlane.xlu0 %606  ;;  %v609_v62 = vpop.xlane.xlu1 %608 }
  0xf5   : > { %v626_v0 = vmul.f32 0.5, %v607_v58  ;;  %v737_v2 = vsel %vm736_vm9, %v735_v59, %v730_v60  ;;  %v627_v5 = vmul.f32 0.5, %v609_v62 }
  0xf6   : > { %v744_v8 = vsel %vm743_vm10, %v742_v1, %v737_v2 }
  0xf7   : > { %v749_v7 = vrot.slane %v626_v0, %v748_v63  ;;  %v756_v13 = vrot.slane %v627_v5, %v755_v4 }
  0xf8   : > { %v611_v6 = vpop.xlane.xlu0 %610  ;;  %v613_v10 = vpop.xlane.xlu1 %612 }
  0xf9   : > { %v628_v12 = vmul.f32 0.5, %v611_v6  ;;  %v751_v14 = vsel %vm750_vm11, %v749_v7, %v744_v8  ;;  %v629_v16 = vmul.f32 0.5, %v613_v10 }
  0xfa   : > { %v758_v19 = vsel %vm757_vm12, %v756_v13, %v751_v14 }
  0xfb   : > { %v763_v18 = vrot.slane %v628_v12, %v762_v11  ;;  %v770_v22 = vrot.slane %v629_v16, %v769_v15 }
  0xfc   : > { %v521_v17 = vpop.xlane.xlu1 %520  ;;  %v519_v20 = vpop.xlane.xlu0 %518 }
  0xfd   : > { %v551_v21 = vmul.f32 0.5, %v521_v17  ;;  %v550_v23 = vmul.f32 0.5, %v519_v20  ;;  %v765_v24 = vsel %vm764_vm13, %v763_v18, %v758_v19 }
  0xfe   : > { %v772_v28 = vsel %vm771_vm14, %v770_v22, %v765_v24 }
 0x150   : > { %v1282_v25 = vpop.f32.mrf.mxu0  ;;  %v1294_v26 = vpop.f32.mrf.mxu1 }
 0x151   : > { %v631_v27 = vsub.f32 %v1282_v25, %v551_v21 }
 0x152   : > { %v423_v29 = vpop.f32.mrf.mxu0  ;;  %v463_v30 = vpop.f32.mrf.mxu1 }
 0x153   : > { %v787_v31 = vsub.f32 %v631_v27, %v772_v28  ;;  %v630_v32 = vsub.f32 %v423_v29, %v550_v23 }
 0x154   : > { %v1285_v54 = vpop.f32.mrf.mxu0  ;;  %v1297_v33 = vpop.f32.mrf.mxu1 }
 0x155   : > { %v803_v34 = vmin.f32 %v787_v31, 0.0  ;;  %v786_v35 = vsub.f32 %v630_v32, %v772_v28 }
 0x156   : > { %v433_v36 = vpop.f32.mrf.mxu0  ;;  %v473_v37 = vpop.f32.mrf.mxu1 }
 0x157   : > { %v820_v38 = vmul.f32 1.442695, %v803_v34  ;;  %v802_v39 = vmin.f32 %v786_v35, 0.0 }
 0x158   : > { %v1288_v40 = vpop.f32.mrf.mxu0  ;;  %v1300_v41 = vpop.f32.mrf.mxu1 }
 0x159   : > { %1413 = vpow2.f32 %v820_v38  ;;  %v818_v42 = vmul.f32 1.442695, %v802_v39 }
 0x15a   : > { %v443_v43 = vpop.f32.mrf.mxu0  ;;  %v483_v44 = vpop.f32.mrf.mxu1 }
 0x15b   : > { %1415 = vpow2.f32 %v818_v42 }
 0x15c   : > { %v1291_v45 = vpop.f32.mrf.mxu0  ;;  %v1303_v46 = vpop.f32.mrf.mxu1 }
 0x15e   : > { %v453_v47 = vpop.f32.mrf.mxu0  ;;  %v493_v48 = vpop.f32.mrf.mxu1 }
 0x166   : > { %v1414_v50 = vpop.eup %1413 }
 0x167   : > { %v867_v53 = vsub.f32 %v851_v49, %v1414_v50 }
 0x168   : > { %v1416_v55 = vpop.eup %1415 }
 0x169   : > { %v954_v56 = vsel %vm936_vm15, %v867_v53, 0.0  ;;  %v866_v57 = vsub.f32 %v850_v51, %v1416_v55 }
 0x16a   : > { %v970_v58 = vmul.f32 %v954_v56, %v954_v56 }
 0x16b   : > { %v953_v59 = vsel %vm936_vm15, %v866_v57, 0.0 }
 0x16c   : > { %v969_v60 = vmul.f32 %v953_v59, %v953_v59  ;;  %1018 = vst [vmem:[%s1872_s18 + $0x8] sm:$0xff] %v970_v58 }
 0x16e   : > { %1017 = vst [vmem:[%s1872_s18] sm:$0xff] %v969_v60 }
 0x16f   : > { %1514 = shalt.err (!%p1511_p4)
}
 0x170   : > { %s1515_s8 = scalar_lea.hbm %s1957_s16, 2048  ;;  %s1519_s4 = scalar_lea.hbm %s2011_s3, 6144 }
 0x171   : > { %p1516_p0 = scmp.ne.s32.totalorder %s1957_s16, %s1515_s8  ;;  %p1520_p6 = scmp.lt.s32.totalorder %s1957_s16, %s2011_s3 }
 0x172   : > { %p1521_p7 = scmp.lt.s32.totalorder %s1519_s4, %s1515_s8 }
 0x173   : > { %p1517_p1 = pnand %p1516_p0, %p1671_p9 }
 0x174   : > { %p1522_p8 = por %p1521_p7, %p1520_p6 }
 0x175   : > { %p1518_p5 = pneg %p1517_p1 }
 0x177   : > { %p1523_p13 = pnand %p1522_p8, %p1518_p5 }
 0x179   : > { %1526 = shalt.err (!%p1523_p13)
}
 0x17a   : > { %s1594_s20 = smov 128   ;;  %s1595_s30 = smov 8  }
 0x17b   : > { %1342 = dma.vmem_to_hbm [thread:$0]  (%p1671_p9), %s1959_s7, 2048, %s1957_s16, %s1034_s28, %s1594_s20, %s1594_s20, %s1595_s30  }
 0x17c PF: > { %p1359_p2 = scmp.ge.s32.totalorder %s1585_s17, 2  ;;  %s1064_s11 = sand.u32 1, %s1565_s12  }
 0x17d   : > { %s1065_s5 = scalar_lea.sflag [#allocation4], %s1064_s11 }
 0x17e   : > { %p1355_p3 = pnand %p1359_p2, %p1678_p11 }
 0x180   : > { %p1356_p10 = pneg %p1355_p3 }
 0x182   : > { %1560 = dma.done.wait (%p1356_p10), %s1065_s5, 2048  }
 0x183   : > { %1562 = vsyncadd (%p1356_p10), %s1065_s5, 4294965248  ;;  %s22_s17 = sadd.s32 1, %s1585_s17   ;;  %s2030_s25 = sld [smem:[#allocation14_spill]] }
 0x184   : > { %p19_p12 = scmp.ge.s32.totalorder %s22_s17, 5   ;;  %s2031_s15 = sld [smem:[#allocation12_spill]] }
 0x185   : > { %s2032_s16 = sld [smem:[#allocation13_spill]]  ;;  %s2033_s12 = smov %s1569_s13 }
 0x186   : > { %s2034_s13 = smov %s1573_s14  ;;  %21 = sbr.rel (!%p19_p12) target bundleno = 10 (0xa), region = 105 }
 0x189   : > { %s2035_s14 = smov %s2030_s25 }
 0x18b   :  { %1070 = vsyncpa [#allocation3], 1 }
 0x18c   :  { %1072 = vsyncpa [#allocation3 + $0x1], 1 }
 0x18d   :  { %1073 = vsyncpa [#allocation6], 1 }
 0x18e   :  { %1075 = vsyncpa [#allocation6 + $0x1], 1 }
 0x18f   :  { %1076 = vsyncpa [#allocation4], 1 }
 0x190   :  { %1078 = vsyncpa [#allocation4 + $0x1], 1 }

</bundles_post_ra>
